<compile_context>
chip_gen: v5e
topology: v5e:2x2
jax: 0.10.0
libtpu: 0.0.40
codegen_flags: <defaults>
</compile_context>

<pallas_src>
import functools

import jax
import jax.numpy as jnp
from jax.experimental import pallas as pl
from jax.experimental.pallas import tpu as pltpu


def _round_up(a, b):
    return ((a + b - 1) // b) * b


def _gat_layer_kernel(x_ref, xt_ref, w_ref, walt_ref, war_ref, b_ref, adj_ref, out_ref,
                      *, num_heads, out_feats, tile_dst, neg_slope, apply_elu, mean_heads):
    f32 = jnp.float32
    bf16 = jnp.bfloat16

    start = pl.multiple_of(pl.program_id(0) * tile_dst, tile_dst)

    x_all = x_ref[...]                                    # [Np, Din]  all source nodes
    x_dst = x_ref[pl.ds(start, tile_dst), :]              # [T,  Din]  this dst tile

    # Source features for aggregation: bf16 MXU matmul, f32 accumulation.
    feat = jnp.dot(x_all.astype(bf16), w_ref[...].astype(bf16),
                   preferred_element_type=f32)            # [Np, H*F]
    feat_bf = feat.astype(bf16)

    # Attention logits in f32 via folded projections (MXU, lane-dense el^T).
    el_t = jnp.dot(walt_ref[...], xt_ref[...], preferred_element_type=f32)   # [H, Np]
    er_d = jnp.dot(x_dst, war_ref[...], preferred_element_type=f32)          # [T, H]

    edge = adj_ref[...].astype(f32) > 0.0                 # [T, Np] edge mask
    neg_big = f32(-1e30)

    acc = None
    outs = []
    for h in range(num_heads):                            # static unroll (H small)
        f0 = h * out_feats
        s = er_d[:, h:h + 1] + el_t[h:h + 1, :]           # [T, Np]
        s = jnp.where(s >= 0, s, neg_slope * s)           # LeakyReLU(0.2)
        s = jnp.where(edge, s, neg_big)                   # mask non-edges
        m = jnp.max(s, axis=1, keepdims=True)
        e = jnp.where(edge, jnp.exp(s - m), f32(0.0))     # unnormalised softmax weights
        denom = jnp.sum(e, axis=1, keepdims=True)         # [T, 1]
        inv = pl.reciprocal(jnp.where(denom > 0, denom, f32(1.0)), approx=True)
        # aggregate first (bf16 MXU), normalise afterwards (zero-in-degree rows stay 0)
        rst = jnp.dot(e.astype(bf16), feat_bf[:, f0:f0 + out_feats],
                      preferred_element_type=f32)         # [T, F]
        rst = rst * inv + b_ref[0:1, f0:f0 + out_feats]   # per-head bias
        if mean_heads:
            acc = rst if acc is None else acc + rst
        else:
            outs.append(rst)

    if mean_heads:                                        # fused h.mean(1)
        out_ref[...] = acc * f32(1.0 / num_heads)
    else:
        full = jnp.concatenate(outs, axis=1)              # [T, H*F] -> one full-width store
        if apply_elu:                                     # fused flatten(1) + ELU
            full = jnp.where(full > 0, full, jnp.exp(full) - f32(1.0))
        out_ref[...] = full


def gat_conv_pallas(x, adj_i8, w, attn_l, attn_r, bias, *, num_heads, out_feats,
                    apply_elu=False, mean_heads=False, tile_dst=256):
    n, in_dim = x.shape
    hf = num_heads * out_feats
    out_cols = out_feats if mean_heads else hf

    # dst-row tile size: multiple of 8 sublanes, no bigger than the (padded) node count.
    # NOTE: on v7x (64 MiB VMEM) keep tile_dst <= ~512 for large graphs; v5e/v6e can go larger.
    tile = _round_up(min(tile_dst, _round_up(n, 8)), 8)
    np_pad = _round_up(n, tile)

    # zero-pad the node set: padded dst rows fall into the zero-in-degree path and are
    # sliced away; padded src columns are masked by adj == 0.
    x_p = jnp.zeros((np_pad, in_dim), jnp.float32).at[:n, :].set(x)
    adj_p = jnp.zeros((np_pad, np_pad), jnp.int8).at[:n, :n].set(adj_i8)
    x_t = x_p.T                                            # [Din, Np] (layout plumbing)

    # Fold attention vectors into the projection:  el = x @ (W@AL),  er = x @ (W@AR).
    w3 = w.reshape(in_dim, num_heads, out_feats)
    wal_t = jnp.einsum("dhf,hf->hd", w3, attn_l)           # [H, Din]
    war = jnp.einsum("dhf,hf->dh", w3, attn_r)             # [Din, H]

    grid = (np_pad // tile,)

    kernel = functools.partial(
        _gat_layer_kernel, num_heads=num_heads, out_feats=out_feats,
        tile_dst=tile, neg_slope=0.2, apply_elu=apply_elu, mean_heads=mean_heads)

    # VMEM budget: resident operands + double-buffered adj/out tiles + in-kernel temporaries,
    # with 2x headroom for (8,128) tile padding, clamped to a cross-generation-safe range.
    est = (4 * (2 * np_pad * in_dim + in_dim * hf + 2 * num_heads * in_dim + hf)
           + 2 * (tile * np_pad * 1 + tile * out_cols * 4)
           + np_pad * hf * 6
           + 4 * tile * np_pad * 4)
    vmem_limit = int(min(max(2 * est + (16 << 20), 32 << 20), 100 << 20))

    out = pl.pallas_call(
        kernel,
        out_shape=jax.ShapeDtypeStruct((np_pad, out_cols), jnp.float32),
        grid_spec=pltpu.PrefetchScalarGridSpec(
            num_scalar_prefetch=0,
            grid=grid,
            in_specs=[
                pl.BlockSpec((np_pad, in_dim), lambda i: (0, 0)),      # x   (all src, resident)
                pl.BlockSpec((in_dim, np_pad), lambda i: (0, 0)),      # x^T (resident)
                pl.BlockSpec((in_dim, hf), lambda i: (0, 0)),          # W
                pl.BlockSpec((num_heads, in_dim), lambda i: (0, 0)),   # (W@AL)^T
                pl.BlockSpec((in_dim, num_heads), lambda i: (0, 0)),   # W@AR
                pl.BlockSpec((1, hf), lambda i: (0, 0)),               # bias
                pl.BlockSpec((tile, np_pad), lambda i: (i, 0)),        # adj dst-tile (pipelined)
            ],
            out_specs=pl.BlockSpec((tile, out_cols), lambda i: (i, 0)),
        ),
        compiler_params=pltpu.CompilerParams(
            dimension_semantics=("parallel",),             # megacore sharding on v7x
            vmem_limit_bytes=vmem_limit),
    )(x_p, x_t, w, wal_t, war, bias, adj_p)
    return out[:n]


def init_gat_params(key, in_dim, hidden_dim, out_dim, num_heads):
    ks = jax.random.split(key, 8)

    def glorot(k, shape):
        fan = shape[0] + shape[1]
        return (jax.random.normal(k, shape, jnp.float32) * jnp.sqrt(2.0 / fan)).astype(jnp.float32)

    return {
        "w1": glorot(ks[0], (in_dim, num_heads * hidden_dim)),
        "al1": glorot(ks[1], (num_heads, hidden_dim)),
        "ar1": glorot(ks[2], (num_heads, hidden_dim)),
        "b1": 0.1 * glorot(ks[3], (1, num_heads * hidden_dim)),
        "w2": glorot(ks[4], (num_heads * hidden_dim, num_heads * out_dim)),
        "al2": glorot(ks[5], (num_heads, out_dim)),
        "ar2": glorot(ks[6], (num_heads, out_dim)),
        "b2": 0.1 * glorot(ks[7], (1, num_heads * out_dim)),
    }


def gat_forward(params, adj, x, *, hidden_dim, out_dim, num_heads, tile_dst=256):
    adj_i8 = (adj > 0).astype(jnp.int8)        # adjacency is only a mask -> compact dtype
    h = gat_conv_pallas(x, adj_i8, params["w1"], params["al1"], params["ar1"], params["b1"],
                        num_heads=num_heads, out_feats=hidden_dim,
                        apply_elu=True, mean_heads=False, tile_dst=tile_dst)   # [N, H*hidden]
    out = gat_conv_pallas(h, adj_i8, params["w2"], params["al2"], params["ar2"], params["b2"],
                          num_heads=num_heads, out_feats=out_dim,
                          apply_elu=False, mean_heads=True, tile_dst=tile_dst)  # [N, out_dim]
    return out


# ---------------- pure-JAX f32 reference (mirrors DGL GATConv math) ----------------
def _gat_conv_ref(x, adj, w, attn_l, attn_r, bias, num_heads, out_feats):
    n = x.shape[0]
    feat = (x @ w).reshape(n, num_heads, out_feats)
    el = jnp.sum(feat * attn_l[None], axis=-1)
    er = jnp.sum(feat * attn_r[None], axis=-1)
    scores = er[:, None, :] + el[None, :, :]
    scores = jnp.where(scores >= 0, scores, 0.2 * scores)
    mask = adj[:, :, None] > 0
    scores = jnp.where(mask, scores, -1e30)
    m = jnp.max(scores, axis=1, keepdims=True)
    e = jnp.where(mask, jnp.exp(scores - m), 0.0)
    denom = jnp.sum(e, axis=1, keepdims=True)
    alpha = e / jnp.where(denom > 0, denom, 1.0)
    rst = jnp.einsum('vuh,uhf->vhf', alpha, feat)
    return rst + bias.reshape(1, num_heads, out_feats)


def gat_forward_ref(params, adj, x, *, hidden_dim, out_dim, num_heads):
    n = x.shape[0]
    h = _gat_conv_ref(x, adj, params["w1"], params["al1"], params["ar1"], params["b1"],
                      num_heads, hidden_dim)
    h = h.reshape(n, num_heads * hidden_dim)
    h = jnp.where(h > 0, h, jnp.exp(h) - 1.0)
    out = _gat_conv_ref(h, adj, params["w2"], params["al2"], params["ar2"], params["b2"],
                        num_heads, out_dim)
    return out.mean(axis=1)


if __name__ == "__main__":
    N, in_dim, hidden_dim, out_dim, num_heads = 8, 16, 8, 4, 2
    key = jax.random.PRNGKey(0)
    k_adj, k_x, k_p = jax.random.split(key, 3)

    # deterministic small graph: random edges + self-loops, one zero-in-degree node
    adj = (jax.random.uniform(k_adj, (N, N)) < 0.4).astype(jnp.float32)
    adj = jnp.maximum(adj, jnp.eye(N, dtype=jnp.float32))
    adj = adj.at[N - 1, :].set(0.0)   # exercise allow_zero_in_degree=True path

    x = jax.random.normal(k_x, (N, in_dim), jnp.float32)
    params = init_gat_params(k_p, in_dim, hidden_dim, out_dim, num_heads)

    out = gat_forward(params, adj, x, hidden_dim=hidden_dim, out_dim=out_dim,
                      num_heads=num_heads)
    out = jax.block_until_ready(out)

    ref = gat_forward_ref(params, adj, x, hidden_dim=hidden_dim, out_dim=out_dim,
                          num_heads=num_heads)
    assert out.shape == (N, out_dim)
    # tolerance reflects bf16 MXU matmuls + approx-reciprocal softmax normalisation
    err = float(jnp.max(jnp.abs(out - ref)))
    assert jnp.allclose(out, ref, rtol=5e-2, atol=5e-2), (err, out, ref)
    print("KERNEL_OK")
</pallas_src>

<mosaic_0001>
module attributes {stable_mosaic.version = 11 : i64} {
  func.func @_gat_layer_kernel(%arg0: i32, %arg1: memref<8x16xf32, #tpu.memory_space<vmem>>, %arg2: memref<16x8xf32, #tpu.memory_space<vmem>>, %arg3: memref<16x16xf32, #tpu.memory_space<vmem>>, %arg4: memref<2x16xf32, #tpu.memory_space<vmem>>, %arg5: memref<16x2xf32, #tpu.memory_space<vmem>>, %arg6: memref<1x16xf32, #tpu.memory_space<vmem>>, %arg7: memref<8x8xi8, #tpu.memory_space<vmem>>, %arg8: memref<8x16xf32, #tpu.memory_space<vmem>>) attributes {dimension_semantics = [#tpu.dimension_semantics<parallel>], iteration_bounds = array<i64: 1>, scalar_prefetch = 0 : i64, scratch_operands = 0 : i64, tpu.core_type = #tpu.core_type<tc>, window_params = [{pipeline_mode = #tpu.pipeline_mode<synchronous>, transform_indices = @transform_0, window_bounds = array<i64: 8, 16>}, {pipeline_mode = #tpu.pipeline_mode<synchronous>, transform_indices = @transform_1, window_bounds = array<i64: 16, 8>}, {pipeline_mode = #tpu.pipeline_mode<synchronous>, transform_indices = @transform_2, window_bounds = array<i64: 16, 16>}, {pipeline_mode = #tpu.pipeline_mode<synchronous>, transform_indices = @transform_3, window_bounds = array<i64: 2, 16>}, {pipeline_mode = #tpu.pipeline_mode<synchronous>, transform_indices = @transform_4, window_bounds = array<i64: 16, 2>}, {pipeline_mode = #tpu.pipeline_mode<synchronous>, transform_indices = @transform_5, window_bounds = array<i64: 1, 16>}, {transform_indices = @transform_6, window_bounds = array<i64: 8, 8>}, {transform_indices = @transform_7, window_bounds = array<i64: 8, 16>}]} {
    %c8_i32 = arith.constant 8 : i32
    %0 = arith.muli %arg0, %c8_i32 : i32
    %1 = tpu.assume_multiple %0, 8 : i32
    %c0 = arith.constant 0 : index
    %c0_0 = arith.constant 0 : index
    %2 = vector.load %arg1[%c0, %c0_0] : memref<8x16xf32, #tpu.memory_space<vmem>>, vector<8x16xf32>
    %3 = arith.index_cast %1 : i32 to index
    %c0_1 = arith.constant 0 : index
    %4 = vector.load %arg1[%3, %c0_1] : memref<8x16xf32, #tpu.memory_space<vmem>>, vector<8x16xf32>
    %5 = arith.truncf %2 : vector<8x16xf32> to vector<8x16xbf16>
    %c0_2 = arith.constant 0 : index
    %c0_3 = arith.constant 0 : index
    %6 = vector.load %arg3[%c0_2, %c0_3] : memref<16x16xf32, #tpu.memory_space<vmem>>, vector<16x16xf32>
    %7 = arith.truncf %6 : vector<16x16xf32> to vector<16x16xbf16>
    %cst = arith.constant dense<0.000000e+00> : vector<8x16xf32>
    %8 = tpu.matmul %5, %7, %cst {dimension_numbers = #tpu.dot_dimension_numbers<[1], [0], [0], [1], [0, 0, 1, 1], [], []>} : vector<8x16xbf16>, vector<16x16xbf16>, vector<8x16xf32> -> vector<8x16xf32>
    %9 = arith.truncf %8 : vector<8x16xf32> to vector<8x16xbf16>
    %c0_4 = arith.constant 0 : index
    %c0_5 = arith.constant 0 : index
    %10 = vector.load %arg4[%c0_4, %c0_5] : memref<2x16xf32, #tpu.memory_space<vmem>>, vector<2x16xf32>
    %c0_6 = arith.constant 0 : index
    %c0_7 = arith.constant 0 : index
    %11 = vector.load %arg2[%c0_6, %c0_7] : memref<16x8xf32, #tpu.memory_space<vmem>>, vector<16x8xf32>
    %cst_8 = arith.constant dense<0.000000e+00> : vector<2x8xf32>
    %12 = tpu.matmul %10, %11, %cst_8 {dimension_numbers = #tpu.dot_dimension_numbers<[1], [0], [0], [1], [0, 0, 1, 1], [], []>} : vector<2x16xf32>, vector<16x8xf32>, vector<2x8xf32> -> vector<2x8xf32>
    %c0_9 = arith.constant 0 : index
    %c0_10 = arith.constant 0 : index
    %13 = vector.load %arg5[%c0_9, %c0_10] : memref<16x2xf32, #tpu.memory_space<vmem>>, vector<16x2xf32>
    %cst_11 = arith.constant dense<0.000000e+00> : vector<8x2xf32>
    %14 = tpu.matmul %4, %13, %cst_11 {dimension_numbers = #tpu.dot_dimension_numbers<[1], [0], [0], [1], [0, 0, 1, 1], [], []>} : vector<8x16xf32>, vector<16x2xf32>, vector<8x2xf32> -> vector<8x2xf32>
    %c0_12 = arith.constant 0 : index
    %c0_13 = arith.constant 0 : index
    %15 = vector.load %arg7[%c0_12, %c0_13] : memref<8x8xi8, #tpu.memory_space<vmem>>, vector<8x8xi8>
    %16 = arith.sitofp %15 : vector<8x8xi8> to vector<8x8xf32>
    %cst_14 = arith.constant 0.000000e+00 : f32
    %17 = vector.broadcast %cst_14 : f32 to vector<8x8xf32>
    %18 = arith.cmpf ogt, %16, %17 : vector<8x8xf32>
    %19 = vector.extract_strided_slice %14 {offsets = [0, 0], sizes = [8, 1], strides = [1, 1]} : vector<8x2xf32> to vector<8x1xf32>
    %20 = vector.extract_strided_slice %12 {offsets = [0, 0], sizes = [1, 8], strides = [1, 1]} : vector<2x8xf32> to vector<1x8xf32>
    %21 = vector.broadcast %19 : vector<8x1xf32> to vector<8x8xf32>
    %22 = vector.broadcast %20 : vector<1x8xf32> to vector<8x8xf32>
    %23 = arith.addf %21, %22 : vector<8x8xf32>
    %cst_15 = arith.constant 0.000000e+00 : f32
    %24 = vector.broadcast %cst_15 : f32 to vector<8x8xf32>
    %25 = arith.cmpf oge, %23, %24 : vector<8x8xf32>
    %cst_16 = arith.constant 2.000000e-01 : f32
    %26 = vector.broadcast %cst_16 : f32 to vector<8x8xf32>
    %27 = arith.mulf %26, %23 : vector<8x8xf32>
    %28 = arith.select %25, %23, %27 : vector<8x8xi1>, vector<8x8xf32>
    %cst_17 = arith.constant -1.000000e+30 : f32
    %29 = vector.broadcast %cst_17 : f32 to vector<8x8xf32>
    %30 = arith.select %18, %28, %29 : vector<8x8xi1>, vector<8x8xf32>
    %cst_18 = arith.constant dense<0xFF800000> : vector<8xf32>
    %31 = vector.multi_reduction <maximumf>, %30, %cst_18 [1] : vector<8x8xf32> to vector<8xf32>
    %32 = vector.shape_cast %31 : vector<8xf32> to vector<8x1xf32>
    %33 = vector.broadcast %32 : vector<8x1xf32> to vector<8x8xf32>
    %34 = arith.subf %30, %33 : vector<8x8xf32>
    %35 = math.exp %34 : vector<8x8xf32>
    %cst_19 = arith.constant 0.000000e+00 : f32
    %36 = vector.broadcast %cst_19 : f32 to vector<8x8xf32>
    %37 = arith.select %18, %35, %36 : vector<8x8xi1>, vector<8x8xf32>
    %cst_20 = arith.constant dense<0.000000e+00> : vector<8xf32>
    %38 = vector.multi_reduction <add>, %37, %cst_20 [1] : vector<8x8xf32> to vector<8xf32>
    %39 = vector.shape_cast %38 : vector<8xf32> to vector<8x1xf32>
    %cst_21 = arith.constant 0.000000e+00 : f32
    %40 = vector.broadcast %cst_21 : f32 to vector<8x1xf32>
    %41 = arith.cmpf ogt, %39, %40 : vector<8x1xf32>
    %cst_22 = arith.constant 1.000000e+00 : f32
    %42 = vector.broadcast %cst_22 : f32 to vector<8x1xf32>
    %43 = arith.select %41, %39, %42 : vector<8x1xi1>, vector<8x1xf32>
    %44 = tpu.reciprocal %43 {approx = true} : vector<8x1xf32> -> vector<8x1xf32>
    %45 = arith.truncf %37 : vector<8x8xf32> to vector<8x8xbf16>
    %46 = vector.extract_strided_slice %9 {offsets = [0, 0], sizes = [8, 8], strides = [1, 1]} : vector<8x16xbf16> to vector<8x8xbf16>
    %cst_23 = arith.constant dense<0.000000e+00> : vector<8x8xf32>
    %47 = tpu.matmul %45, %46, %cst_23 {dimension_numbers = #tpu.dot_dimension_numbers<[1], [0], [0], [1], [0, 0, 1, 1], [], []>} : vector<8x8xbf16>, vector<8x8xbf16>, vector<8x8xf32> -> vector<8x8xf32>
    %48 = vector.broadcast %44 : vector<8x1xf32> to vector<8x8xf32>
    %49 = arith.mulf %47, %48 : vector<8x8xf32>
    %c0_24 = arith.constant 0 : index
    %c0_25 = arith.constant 0 : index
    %50 = vector.load %arg6[%c0_24, %c0_25] : memref<1x16xf32, #tpu.memory_space<vmem>>, vector<1x8xf32>
    %51 = vector.broadcast %50 : vector<1x8xf32> to vector<8x8xf32>
    %52 = arith.addf %49, %51 : vector<8x8xf32>
    %53 = vector.extract_strided_slice %14 {offsets = [0, 1], sizes = [8, 1], strides = [1, 1]} : vector<8x2xf32> to vector<8x1xf32>
    %54 = vector.extract_strided_slice %12 {offsets = [1, 0], sizes = [1, 8], strides = [1, 1]} : vector<2x8xf32> to vector<1x8xf32>
    %55 = vector.broadcast %53 : vector<8x1xf32> to vector<8x8xf32>
    %56 = vector.broadcast %54 : vector<1x8xf32> to vector<8x8xf32>
    %57 = arith.addf %55, %56 : vector<8x8xf32>
    %cst_26 = arith.constant 0.000000e+00 : f32
    %58 = vector.broadcast %cst_26 : f32 to vector<8x8xf32>
    %59 = arith.cmpf oge, %57, %58 : vector<8x8xf32>
    %cst_27 = arith.constant 2.000000e-01 : f32
    %60 = vector.broadcast %cst_27 : f32 to vector<8x8xf32>
    %61 = arith.mulf %60, %57 : vector<8x8xf32>
    %62 = arith.select %59, %57, %61 : vector<8x8xi1>, vector<8x8xf32>
    %cst_28 = arith.constant -1.000000e+30 : f32
    %63 = vector.broadcast %cst_28 : f32 to vector<8x8xf32>
    %64 = arith.select %18, %62, %63 : vector<8x8xi1>, vector<8x8xf32>
    %cst_29 = arith.constant dense<0xFF800000> : vector<8xf32>
    %65 = vector.multi_reduction <maximumf>, %64, %cst_29 [1] : vector<8x8xf32> to vector<8xf32>
    %66 = vector.shape_cast %65 : vector<8xf32> to vector<8x1xf32>
    %67 = vector.broadcast %66 : vector<8x1xf32> to vector<8x8xf32>
    %68 = arith.subf %64, %67 : vector<8x8xf32>
    %69 = math.exp %68 : vector<8x8xf32>
    %cst_30 = arith.constant 0.000000e+00 : f32
    %70 = vector.broadcast %cst_30 : f32 to vector<8x8xf32>
    %71 = arith.select %18, %69, %70 : vector<8x8xi1>, vector<8x8xf32>
    %cst_31 = arith.constant dense<0.000000e+00> : vector<8xf32>
    %72 = vector.multi_reduction <add>, %71, %cst_31 [1] : vector<8x8xf32> to vector<8xf32>
    %73 = vector.shape_cast %72 : vector<8xf32> to vector<8x1xf32>
    %cst_32 = arith.constant 0.000000e+00 : f32
    %74 = vector.broadcast %cst_32 : f32 to vector<8x1xf32>
    %75 = arith.cmpf ogt, %73, %74 : vector<8x1xf32>
    %cst_33 = arith.constant 1.000000e+00 : f32
    %76 = vector.broadcast %cst_33 : f32 to vector<8x1xf32>
    %77 = arith.select %75, %73, %76 : vector<8x1xi1>, vector<8x1xf32>
    %78 = tpu.reciprocal %77 {approx = true} : vector<8x1xf32> -> vector<8x1xf32>
    %79 = arith.truncf %71 : vector<8x8xf32> to vector<8x8xbf16>
    %80 = vector.extract_strided_slice %9 {offsets = [0, 8], sizes = [8, 8], strides = [1, 1]} : vector<8x16xbf16> to vector<8x8xbf16>
    %cst_34 = arith.constant dense<0.000000e+00> : vector<8x8xf32>
    %81 = tpu.matmul %79, %80, %cst_34 {dimension_numbers = #tpu.dot_dimension_numbers<[1], [0], [0], [1], [0, 0, 1, 1], [], []>} : vector<8x8xbf16>, vector<8x8xbf16>, vector<8x8xf32> -> vector<8x8xf32>
    %82 = vector.broadcast %78 : vector<8x1xf32> to vector<8x8xf32>
    %83 = arith.mulf %81, %82 : vector<8x8xf32>
    %c0_35 = arith.constant 0 : index
    %c8 = arith.constant 8 : index
    %84 = vector.load %arg6[%c0_35, %c8] : memref<1x16xf32, #tpu.memory_space<vmem>>, vector<1x8xf32>
    %85 = vector.broadcast %84 : vector<1x8xf32> to vector<8x8xf32>
    %86 = arith.addf %83, %85 : vector<8x8xf32>
    %87 = tpu.concatenate %52, %86 in 1 : vector<8x8xf32>, vector<8x8xf32> -> vector<8x16xf32>
    %cst_36 = arith.constant 0.000000e+00 : f32
    %88 = vector.broadcast %cst_36 : f32 to vector<8x16xf32>
    %89 = arith.cmpf ogt, %87, %88 : vector<8x16xf32>
    %90 = math.exp %87 : vector<8x16xf32>
    %cst_37 = arith.constant 1.000000e+00 : f32
    %91 = vector.broadcast %cst_37 : f32 to vector<8x16xf32>
    %92 = arith.subf %90, %91 : vector<8x16xf32>
    %93 = arith.select %89, %87, %92 : vector<8x16xi1>, vector<8x16xf32>
    %c0_38 = arith.constant 0 : index
    %c0_39 = arith.constant 0 : index
    %94 = vector.load %arg8[%c0_38, %c0_39] : memref<8x16xf32, #tpu.memory_space<vmem>>, vector<8x16xf32>
    tpu.vector_store %arg8[%c0_38, %c0_39], %93 {strides = array<i32>} : memref<8x16xf32, #tpu.memory_space<vmem>>, vector<8x16xf32>,
    return
  }
  func.func @transform_0(%arg0: i32) -> (i32, i32) {
    %c0_i32 = arith.constant 0 : i32
    %c0_i32_0 = arith.constant 0 : i32
    %c0_i32_1 = arith.constant 0 : i32
    return %c0_i32, %c0_i32_0 : i32, i32
  }
  func.func @transform_1(%arg0: i32) -> (i32, i32) {
    %c0_i32 = arith.constant 0 : i32
    %c0_i32_0 = arith.constant 0 : i32
    %c0_i32_1 = arith.constant 0 : i32
    return %c0_i32, %c0_i32_0 : i32, i32
  }
  func.func @transform_2(%arg0: i32) -> (i32, i32) {
    %c0_i32 = arith.constant 0 : i32
    %c0_i32_0 = arith.constant 0 : i32
    %c0_i32_1 = arith.constant 0 : i32
    return %c0_i32, %c0_i32_0 : i32, i32
  }
  func.func @transform_3(%arg0: i32) -> (i32, i32) {
    %c0_i32 = arith.constant 0 : i32
    %c0_i32_0 = arith.constant 0 : i32
    %c0_i32_1 = arith.constant 0 : i32
    return %c0_i32, %c0_i32_0 : i32, i32
  }
  func.func @transform_4(%arg0: i32) -> (i32, i32) {
    %c0_i32 = arith.constant 0 : i32
    %c0_i32_0 = arith.constant 0 : i32
    %c0_i32_1 = arith.constant 0 : i32
    return %c0_i32, %c0_i32_0 : i32, i32
  }
  func.func @transform_5(%arg0: i32) -> (i32, i32) {
    %c0_i32 = arith.constant 0 : i32
    %c0_i32_0 = arith.constant 0 : i32
    %c0_i32_1 = arith.constant 0 : i32
    return %c0_i32, %c0_i32_0 : i32, i32
  }
  func.func @transform_6(%arg0: i32) -> (i32, i32) {
    %c0_i32 = arith.constant 0 : i32
    %c0_i32_0 = arith.constant 0 : i32
    return %arg0, %c0_i32 : i32, i32
  }
  func.func @transform_7(%arg0: i32) -> (i32, i32) {
    %c0_i32 = arith.constant 0 : i32
    %c0_i32_0 = arith.constant 0 : i32
    return %arg0, %c0_i32 : i32, i32
  }
}

</mosaic_0001>

<bundles_post_ra>
// kernel: tpu_custom_call.1
= control target key start
LH: loop header
LB: loop body
LE: loop exit
PB: predicated region body
PF: predicated region fallthrough
CT: control target
= control target key end

     0   :  { %vm36_vm0 = vcmask 130048   ;;  %s387_s0 = inlined_call_operand.vmem [shape: f32[8,16], index: 0, kind: input, shape index: {}]   ;;  %s388_s1 = inlined_call_operand.vmem [shape: f32[16,8], index: 1, kind: input, shape index: {}]   ;;  %s389_s2 = inlined_call_operand.vmem [shape: f32[16,16], index: 2, kind: input, shape index: {}]   ;;  %s390_s3 = inlined_call_operand.vmem [shape: f32[2,16], index: 3, kind: input, shape index: {}]   ;;  %s391_s4 = inlined_call_operand.vmem [shape: f32[16,2], index: 4, kind: input, shape index: {}]   ;;  %s392_s5 = inlined_call_operand.vmem [shape: f32[1,16], index: 5, kind: input, shape index: {}]   ;;  %s393_s6 = inlined_call_operand.vmem [shape: s8[8,8], index: 6, kind: input, shape index: {}]   ;;  %s394_s7 = inlined_call_operand.hbm [shape: f32[8,16], index: 7, kind: output, shape index: {}]  }
   0x1   :  { %v56_v0 = vld [vmem:[%s388_s1 + $0x8] sm:$0xff]  ;;  %v55_v1 = vld [vmem:[%s388_s1] sm:$0xff] }
   0x2   :  { %74 = vmatpush.msra.mxu2 %v56_v0  ;;  %v54_v2 = vld [vmem:[%s390_s3] sm:$0x3]  ;;  %v81_v3 = vld [vmem:[%s391_s4 + $0x8] sm:$0xff] }
   0x3   :  { %12 = vsyncpa [#allocation3], 0  ;;  %v80_v4 = vld [vmem:[%s391_s4] sm:$0xff]  ;;  %v292_v6 = vmov 1   ;;  %v34_v8 = vld [vmem:[%s389_s2 + $0x8] sm:$0xff]  ;;  %v293_v13 = vmov 0  }
   0x4   :  { %75 = vmatpush.msra.mxu2 %v55_v1  ;;  %v31_v5 = vld [vmem:[%s387_s0] sm:$0xff]  ;;  %252 = vset.pattern.permute.xlu0 %v292_v6  ;;  %vm138_vm1 = vcmask 1043456   ;;  %vm120_vm4 = vcmask 64512   ;;  %s294_s4 = smov 120   ;;  %s295_s16 = smov 8  }
   0x5   :  { %242 = vmatmul.msk.f32.vlgmr.msra.gmra.mxu2 %vm36_vm0, %v54_v2  ;;  %v33_v7 = vld [vmem:[%s389_s2] sm:$0xff]  ;;  %v32_v10 = vpack.c.bf16 %v31_v5, %v31_v5  ;;  %s232_s20 = sshll.u32 %s394_s7, 4  ;;  %s233_s20 = int_to_ptr.hbm [resolvable:$true] %s232_s20 }
   0x6   :  { %99 = vmatpush.msrb.mxu2 %v81_v3  ;;  %v35_v9 = vpack.c.bf16 %v34_v8, %v33_v7  ;;  %v105_v17 = vld [vmem:[%s393_s6] sm:$0x3] }
   0x7   :  { %v106_v19 = vunpack.c.0.s8 %v105_v17  ;;  %v255_v53 = vld [vmem:[%s392_s5] ss:$0 sm:$0xff]  ;;  %s296_s5 = smov [#allocation2]  }
   0x8   :  { %100 = vmatpush.msrb.mxu2 %v80_v4  ;;  %47 = vmatpush.bf16.msra.mxu0 %v35_v9  ;;  %s230_s17 = sshll.u32 %s296_s5, 4  ;;  %s231_s17 = int_to_ptr.vmem [resolvable:$true] %s230_s17 }
   0x9   :  { %v107_v21 = vcvt.s32.f32 %v106_v19 }
   0xb   :  { %241 = vmatmul.msk.bf16.vlgmr.msra.gmra.mxu0 %vm36_vm0, %v32_v10  ;;  %vm108_vm2 = vcmp.gt.f32.partialorder %v107_v21, 0.0 }
   0xd   :  { %243 = vmatmul.msk.f32.vlgmr.msrb.gmra.mxu2 %vm36_vm0, %v31_v5 }
  0x88   :  { %v77_v11 = vpop.f32.mrf.mxu2  ;;  %v49_v14 = vpop.f32.mrf.mxu0 }
  0x89   :  { %v53_v15 = vpack.c.bf16 %v49_v14, %v49_v14  ;;  %v165_v20 = vperm.slane %v77_v11, 1  ;;  %v114_v28 = vperm.slane %v77_v11, 0 }
  0x8b   :  { %v140_v16 = vsel %vm138_vm1, %v53_v15, 0  ;;  %v186_v35 = vunpack.c.l.b16 %v53_v15 }
  0x8c   :  { %149 = vmatpush.bf16.msra.mxu3 %v140_v16 }
  0x8d   :  { %v187_v36 = vpack.c.b16 %v186_v35, %v186_v35 }
  0x90   :  { %v102_v12 = vpop.f32.mrf.mxu2  ;;  %v51_v18 = vpop.f32.mrf.mxu0 }
  0x91   :  { %162 = vperm.xlu0 %252, %v102_v12  }
  0x99   :  { %253 = vset.pattern.permute.xlu0 %v293_v13 }
  0x9a   :  { %111 = vperm.xlu0 %253, %v102_v12  }
  0xa2   :  { %254 = vset.pattern.permute.xlu0 %v292_v6 }
 0x103   :  { %v163_v22 = vpop.permute.xlu0 %162 }
 0x104   :  { %v166_v23 = vadd.f32 %v165_v20, %v163_v22 }
 0x106   :  { %v168_v24 = vmul.f32 0.2, %v166_v23  ;;  %vm167_vm3 = vcmp.ge.f32.partialorder %v166_v23, 0.0 }
 0x108   :  { %v169_v25 = vsel %vm167_vm3, %v166_v23, %v168_v24 }
 0x109   :  { %v170_v26 = vsel %vm108_vm2, %v169_v25, -1e+30 }
 0x10a   :  { %v171_v27 = vsel %vm120_vm4, %v170_v26, -inf }
 0x10b   :  { %172 = vmax.xlane.f32.xlu1 %v171_v27 }
 0x10c   :  { %v112_v29 = vpop.permute.xlu0 %111 }
 0x10d   :  { %v115_v30 = vadd.f32 %v114_v28, %v112_v29 }
 0x10f   :  { %v117_v31 = vmul.f32 0.2, %v115_v30  ;;  %vm116_vm5 = vcmp.ge.f32.partialorder %v115_v30, 0.0 }
 0x111   :  { %v118_v32 = vsel %vm116_vm5, %v115_v30, %v117_v31 }
 0x112   :  { %v119_v33 = vsel %vm108_vm2, %v118_v32, -1e+30 }
 0x113   :  { %v121_v34 = vsel %vm120_vm4, %v119_v33, -inf }
 0x114   :  { %122 = vmax.xlane.f32.xlu2 %v121_v34 }
 0x124   :  { %188 = vrot.lane.b32.xlu1 %v187_v36, %s294_s4 }
 0x17e   :  { %v173_v37 = vpop.xlane.xlu1 %172 }
 0x17f   :  { %v174_v38 = vsub.f32 %v170_v26, %v173_v37 }
 0x181   :  { %v175_v39 = vmul.f32 1.442695, %v174_v38 }
 0x183   :  { %256 = vpow2.f32 %v175_v39 }
 0x187   :  { %v123_v40 = vpop.xlane.xlu2 %122 }
 0x188   :  { %v124_v41 = vsub.f32 %v119_v33, %v123_v40 }
 0x189   :  { %v257_v42 = vpop.eup %256 }
 0x18a   :  { %v125_v43 = vmul.f32 1.442695, %v124_v41  ;;  %v177_v44 = vsel %vm108_vm2, %v257_v42, 0.0 }
 0x18b   :  { %v178_v45 = vsel %vm120_vm4, %v177_v44, 0.0  ;;  %v184_v52 = vpack.c.bf16 %v177_v44, %v177_v44 }
 0x18c   :  { %258 = vpow2.f32 %v125_v43  ;;  %179 = vadd.xlane.f32.xlu2 %v178_v45 }
 0x192   :  { %v259_v46 = vpop.eup %258 }
 0x193   :  { %v127_v47 = vsel %vm108_vm2, %v259_v46, 0.0 }
 0x194   :  { %v128_v48 = vsel %vm120_vm4, %v127_v47, 0.0  ;;  %v134_v49 = vpack.c.bf16 %v127_v47, %v127_v47 }
 0x195   :  { %129 = vadd.xlane.f32.xlu0 %v128_v48 }
 0x196   :  { %v189_v50 = vpop.permute.xlu1 %188  ;;  %244 = vmatmul.msk.bf16.vlgmr.msra.gmra.mxu3 %vm120_vm4, %v134_v49 }
 0x197   :  { %v194_v51 = vsel %vm138_vm1, %v189_v50, 0 }
 0x198   :  { %203 = vmatpush.bf16.msra.mxu1 %v194_v51 }
 0x19b   :  { %245 = vmatmul.msk.bf16.vlgmr.msra.gmra.mxu1 %vm120_vm4, %v184_v52 }
 0x1a4   :  { %210 = vrot.lane.b32.xlu2 %v255_v53, %s294_s4 }
 0x1ff   :  { %v180_v54 = vpop.xlane.xlu2 %179 }
 0x200   :  { %vm181_vm6 = vcmp.gt.f32.partialorder %v180_v54, 0.0 }
 0x201   :  { %v182_v55 = vsel %vm181_vm6, %v180_v54, 1.0 }
 0x202   :  { %260 = vrcp.f32 %v182_v55 }
 0x207   :  { %v211_v58 = vpop.permute.xlu2 %210 }
 0x208   :  { %v261_v56 = vpop.eup %260  ;;  %v130_v0 = vpop.xlane.xlu0 %129 }
 0x209   :  { %vm131_vm7 = vcmp.gt.f32.partialorder %v130_v0, 0.0 }
 0x20a   :  { %v132_v1 = vsel %vm131_vm7, %v130_v0, 1.0 }
 0x20b   :  { %262 = vrcp.f32 %v132_v1 }
 0x211   :  { %v263_v2 = vpop.eup %262 }
 0x218   :  { %v205_v57 = vpop.f32.mrf.mxu1 }
 0x219   :  { %v209_v59 = vmul.f32 %v261_v56, %v205_v57  ;;  %v151_v60 = vpop.f32.mrf.mxu3 }
 0x21a   :  { %v155_v3 = vmul.f32 %v263_v2, %v151_v60 }
 0x21b   :  { %v213_v61 = vadd.f32 %v211_v58, %v209_v59 }
 0x21c   :  { %v160_v4 = vadd.f32 %v255_v53, %v155_v3 }
 0x21d   :  { %215 = vrot.lane.b32.xlu1 %v213_v61, %s295_s16 }
 0x220   :  { %v207_v62 = vpop.f32.mrf.mxu1 }
 0x221   :  { %v153_v63 = vpop.f32.mrf.mxu3 }
 0x28f   :  { %v216_v5 = vpop.permute.xlu1 %215 }
 0x290   :  { %v218_v6 = vsel %vm120_vm4, %v160_v4, %v216_v5 }
 0x291   :  { %v220_v7 = vmul.f32 1.442695, %v218_v6  ;;  %vm219_vm8 = vcmp.gt.f32.partialorder %v218_v6, 0.0 }
 0x293   :  { %264 = vpow2.f32 %v220_v7 }
 0x299   :  { %v265_v8 = vpop.eup %264 }
 0x29a   :  { %v246_v9 = vadd.f32 -1.0, %v265_v8 }
 0x29c   :  { %v223_v10 = vsel %vm219_vm8, %v218_v6, %v246_v9 }
 0x29d   :  { %224 = vst.msk [vmem:[#allocation2] sm:$0xff] %vm36_vm0, %v223_v10 }
 0x29e   :  { %235 = dma.vmem_to_hbm [thread:$0]  %s231_s17, 128, %s233_s20, [#allocation3]  }
 0x29f   :  { %290 = dma.done.wait [#allocation3], 128  }
 0x2a0   :  { %291 = vsyncadd [#allocation3], 4294967168 }
 0x2a1   :  { %240 = vsyncpa [#allocation3], 1 }

</bundles_post_ra>
